<compile_context>
chip_gen: v5e
topology: v5e:2x2
jax: 0.10.0
libtpu: 0.0.40
codegen_flags: <defaults>
</compile_context>

<pallas_src>
import functools

import jax
import jax.numpy as jnp
from jax.experimental import pallas as pl
from jax.experimental.pallas import tpu as pltpu

EPS = 1e-5


def _round_up(n, m):
    return ((n + m - 1) // m) * m


def selectivenet_kernel(
    num_backbone,            # static: num_layers - 1 backbone blocks
    num_class,               # static
    # inputs
    x_ref,                   # (batch, in_pad)            bf16 (zero-padded)
    w_in_ref,                # (in_pad, hidden)           bf16 (zero-padded rows)
    w_hid_ref,               # (max(nb-1,1), hidden, hidden) bf16
    w_sel_ref,               # (hidden, hidden)           bf16  (sel head Linear 1)
    w_head_ref,              # (hidden, out_width)        bf16  [wc | wa | 0...]
    b_head_ref,              # (1, out_width)             f32   [bc | ba | bs2 | 0...]
    vec_ref,                 # (rows, hidden)             f32   packed bias/BN vectors
    # output
    out_ref,                 # (batch, out_width)         f32   [cls | aux | sel | 0...]
):
    def vec(i):              # one packed (1, hidden) row
        return vec_ref[i:i + 1, :]

    def bn_train(z, gamma, beta):
        # One pass over z: sum and sum-of-squares together, then a single
        # fused scale/shift over the (batch, hidden) tensor.
        n = z.shape[0]
        s1 = jnp.sum(z, axis=0, keepdims=True)
        s2 = jnp.sum(z * z, axis=0, keepdims=True)
        mu = s1 * (1.0 / n)
        var = s2 * (1.0 / n) - mu * mu            # biased batch variance
        scale = gamma * jax.lax.rsqrt(var + EPS)  # (1, hidden)
        shift = beta - mu * scale                 # (1, hidden)
        return z * scale + shift

    # ---- backbone: h = relu(BN(Linear(h))) x num_backbone -----------------
    z = jnp.dot(x_ref[...], w_in_ref[...],
                preferred_element_type=jnp.float32) + vec(0)
    h = jnp.maximum(bn_train(z, vec(1), vec(2)), 0.0)
    for l in range(1, num_backbone):              # static unroll
        z = jnp.dot(h.astype(jnp.bfloat16), w_hid_ref[l - 1],
                    preferred_element_type=jnp.float32) + vec(3 * l)
        h = jnp.maximum(bn_train(z, vec(3 * l + 1), vec(3 * l + 2)), 0.0)

    hb = h.astype(jnp.bfloat16)

    # ---- fused cls|aux head: one lane-dense matmul into the output slab ----
    # lanes [0:nc] = cls logits, [nc:2nc] = aux logits, lane 2nc currently
    # holds bs2 (from b_head), remaining lanes are zero.
    head = jnp.dot(hb, w_head_ref[...],
                   preferred_element_type=jnp.float32) + b_head_ref[...]

    # ---- selection head: Linear -> BN -> Linear(->1) -> sigmoid ------------
    sb = 3 * num_backbone
    zs = jnp.dot(hb, w_sel_ref[...],
                 preferred_element_type=jnp.float32) + vec(sb)
    s = bn_train(zs, vec(sb + 1), vec(sb + 2))
    ws2_row = vec(sb + 3)                                     # (1, hidden)
    # final 1-wide Linear as a lane reduction (avoids a 1/128-utilized matmul);
    # bs2 comes from head lane 2*num_class (w_head column there is zero).
    sel_bias = head[:, 2 * num_class:2 * num_class + 1]       # (batch, 1) == bs2
    sel_logit = jnp.sum(s * ws2_row, axis=1, keepdims=True) + sel_bias
    # sigmoid: exp on the EUP + approximate reciprocal (also EUP), fp32 math.
    sel = pl.reciprocal(1.0 + jnp.exp(-sel_logit), approx=True)

    # ---- scatter sel into lane 2*num_class; single unmasked store ----------
    lane = jax.lax.broadcasted_iota(jnp.int32, head.shape, 1)
    out_ref[...] = jnp.where(lane == 2 * num_class, sel, head)


def init_params(key, num_layers, input_dim, hidden_dim, num_class):
    """PyTorch-style init: Linear weights/biases ~ U(-1/sqrt(fan_in), ...),
    BatchNorm gamma=1, beta=0.  Weights stored as (in_dim, out_dim)."""

    def lin(key, fan_in, fan_out):
        k1, k2 = jax.random.split(key)
        bound = 1.0 / (fan_in ** 0.5)
        w = jax.random.uniform(k1, (fan_in, fan_out), jnp.float32, -bound, bound)
        b = jax.random.uniform(k2, (fan_out,), jnp.float32, -bound, bound)
        return w, b

    nb = num_layers - 1
    keys = jax.random.split(key, nb + 4)
    dims = [input_dim] + [hidden_dim] * nb
    bb_w, bb_b = [], []
    for l in range(nb):
        w, b = lin(keys[l], dims[l], dims[l + 1])
        bb_w.append(w)
        bb_b.append(b)
    wc, bc = lin(keys[nb], hidden_dim, num_class)
    ws1, bs1 = lin(keys[nb + 1], hidden_dim, hidden_dim)
    ws2, bs2 = lin(keys[nb + 2], hidden_dim, 1)
    wa, ba = lin(keys[nb + 3], hidden_dim, num_class)

    ones = jnp.ones((hidden_dim,), jnp.float32)
    zeros = jnp.zeros((hidden_dim,), jnp.float32)
    return dict(
        bb_w=bb_w, bb_b=bb_b, bb_g=[ones] * nb, bb_beta=[zeros] * nb,
        wc=wc, bc=bc, wa=wa, ba=ba,
        ws1=ws1, bs1=bs1, gs=ones, bes=zeros, ws2=ws2, bs2=bs2,
    )


@functools.partial(jax.jit, static_argnames=("num_class", "num_layers"))
def mlp_selectivenet_forward(x, params, *, num_class, num_layers):
    batch, input_dim = x.shape
    hidden = params["ws1"].shape[0]
    nb = num_layers - 1
    in_pad = _round_up(input_dim, 128)
    out_width = _round_up(2 * num_class + 1, 128)

    # ---- pack inputs: lane-dense, bf16 weights, few DMAs --------------------
    x_pad = (jnp.zeros((batch, in_pad), jnp.float32)
             .at[:, :input_dim].set(x).astype(jnp.bfloat16))
    w_in = (jnp.zeros((in_pad, hidden), jnp.float32)
            .at[:input_dim, :].set(params["bb_w"][0]).astype(jnp.bfloat16))
    if nb >= 2:
        w_hid = jnp.stack(params["bb_w"][1:]).astype(jnp.bfloat16)
    else:  # unused dummy so the kernel signature stays fixed
        w_hid = jnp.zeros((1, hidden, hidden), jnp.bfloat16)
    w_sel = params["ws1"].astype(jnp.bfloat16)

    # fused cls|aux head weight, zero-padded to a 128-lane block
    w_head = jnp.zeros((hidden, out_width), jnp.float32)
    w_head = w_head.at[:, :num_class].set(params["wc"])
    w_head = w_head.at[:, num_class:2 * num_class].set(params["wa"])
    w_head = w_head.astype(jnp.bfloat16)

    # head bias: [bc | ba | bs2 | 0...]; bs2 lands in lane 2*num_class so the
    # head matmul broadcasts it per-row for free (that lane's weights are 0).
    b_head = jnp.zeros((1, out_width), jnp.float32)
    b_head = b_head.at[0, :num_class].set(params["bc"])
    b_head = b_head.at[0, num_class:2 * num_class].set(params["ba"])
    b_head = b_head.at[0, 2 * num_class].set(params["bs2"][0])

    # all (hidden,)-wide bias/BN vectors + ws2 row packed into one fp32 slab
    rows = []
    for l in range(nb):
        rows += [params["bb_b"][l], params["bb_g"][l], params["bb_beta"][l]]
    rows += [params["bs1"], params["gs"], params["bes"],
             params["ws2"].reshape(-1)]
    n_vec = len(rows)                                   # 3*nb + 4
    vecs = (jnp.zeros((_round_up(n_vec, 8), hidden), jnp.float32)
            .at[:n_vec].set(jnp.stack(rows)))

    kernel = functools.partial(selectivenet_kernel, nb, num_class)
    vmem = pl.BlockSpec(memory_space=pltpu.MemorySpace.VMEM)
    slab = pl.pallas_call(
        kernel,
        out_shape=jax.ShapeDtypeStruct((batch, out_width), jnp.float32),
        in_specs=[vmem] * 7,
        out_specs=vmem,
    )(x_pad, w_in, w_hid, w_sel, w_head, b_head, vecs)

    cls_out = slab[:, :num_class]
    aux_out = slab[:, num_class:2 * num_class]
    sel_out = slab[:, 2 * num_class:2 * num_class + 1]
    return cls_out, sel_out, aux_out


def reference_forward(x, params, *, num_layers):
    """Pure-JAX fp32 reference mirroring the PyTorch forward (training-mode BN)."""

    def bn(z, g, beta):
        mu = jnp.mean(z, axis=0, keepdims=True)
        var = jnp.mean((z - mu) ** 2, axis=0, keepdims=True)
        return (z - mu) / jnp.sqrt(var + EPS) * g + beta

    p = params
    h = x
    for l in range(num_layers - 1):
        h = jax.nn.relu(bn(h @ p["bb_w"][l] + p["bb_b"][l],
                           p["bb_g"][l], p["bb_beta"][l]))
    cls_out = h @ p["wc"] + p["bc"]
    s = bn(h @ p["ws1"] + p["bs1"], p["gs"], p["bes"])
    sel_out = jax.nn.sigmoid(s @ p["ws2"] + p["bs2"])
    aux_out = h @ p["wa"] + p["ba"]
    return cls_out, sel_out, aux_out


if __name__ == "__main__":
    # num_layers=3 -> 2 backbone blocks; small deterministic sizes.
    batch, input_dim, hidden_dim, num_class, num_layers = 8, 64, 128, 10, 3

    key = jax.random.PRNGKey(0)
    kx, kp = jax.random.split(key)
    x = jax.random.normal(kx, (batch, input_dim), jnp.float32)
    params = init_params(kp, num_layers, input_dim, hidden_dim, num_class)

    cls_out, sel_out, aux_out = mlp_selectivenet_forward(
        x, params, num_class=num_class, num_layers=num_layers)
    jax.block_until_ready((cls_out, sel_out, aux_out))

    cls_ref, sel_ref, aux_ref = reference_forward(x, params, num_layers=num_layers)
    assert cls_out.shape == (batch, num_class)
    assert sel_out.shape == (batch, 1)
    assert aux_out.shape == (batch, num_class)
    # bf16 MXU operands (fp32 accumulation, fp32 BN) vs fp32 reference:
    # use a slightly looser tolerance than a pure-fp32 kernel would need.
    assert jnp.allclose(cls_out, cls_ref, atol=3e-2, rtol=3e-2)
    assert jnp.allclose(sel_out, sel_ref, atol=3e-2, rtol=3e-2)
    assert jnp.allclose(aux_out, aux_ref, atol=3e-2, rtol=3e-2)

    print("KERNEL_OK")
</pallas_src>

<mosaic_0001>
module attributes {stable_mosaic.version = 11 : i64} {
  func.func @selectivenet_kernel(%arg0: memref<8x128xbf16, #tpu.memory_space<vmem>>, %arg1: memref<128x128xbf16, #tpu.memory_space<vmem>>, %arg2: memref<1x128x128xbf16, #tpu.memory_space<vmem>>, %arg3: memref<128x128xbf16, #tpu.memory_space<vmem>>, %arg4: memref<128x128xbf16, #tpu.memory_space<vmem>>, %arg5: memref<1x128xf32, #tpu.memory_space<vmem>>, %arg6: memref<16x128xf32, #tpu.memory_space<vmem>>, %arg7: memref<8x128xf32, #tpu.memory_space<vmem>>) attributes {dimension_semantics = [], scalar_prefetch = 0 : i64, scratch_operands = 0 : i64, tpu.core_type = #tpu.core_type<tc>} {
    %c0 = arith.constant 0 : index
    %c0_0 = arith.constant 0 : index
    %0 = vector.load %arg0[%c0, %c0_0] : memref<8x128xbf16, #tpu.memory_space<vmem>>, vector<8x128xbf16>
    %c0_1 = arith.constant 0 : index
    %c0_2 = arith.constant 0 : index
    %1 = vector.load %arg1[%c0_1, %c0_2] : memref<128x128xbf16, #tpu.memory_space<vmem>>, vector<128x128xbf16>
    %cst = arith.constant dense<0.000000e+00> : vector<8x128xf32>
    %2 = tpu.matmul %0, %1, %cst {dimension_numbers = #tpu.dot_dimension_numbers<[1], [0], [0], [1], [0, 0, 1, 1], [], []>} : vector<8x128xbf16>, vector<128x128xbf16>, vector<8x128xf32> -> vector<8x128xf32>
    %c0_3 = arith.constant 0 : index
    %c0_4 = arith.constant 0 : index
    %3 = vector.load %arg6[%c0_3, %c0_4] : memref<16x128xf32, #tpu.memory_space<vmem>>, vector<1x128xf32>
    %4 = vector.broadcast %3 : vector<1x128xf32> to vector<8x128xf32>
    %5 = arith.addf %2, %4 : vector<8x128xf32>
    %c1 = arith.constant 1 : index
    %c0_5 = arith.constant 0 : index
    %6 = vector.load %arg6[%c1, %c0_5] : memref<16x128xf32, #tpu.memory_space<vmem>>, vector<1x128xf32>
    %c2 = arith.constant 2 : index
    %c0_6 = arith.constant 0 : index
    %7 = vector.load %arg6[%c2, %c0_6] : memref<16x128xf32, #tpu.memory_space<vmem>>, vector<1x128xf32>
    %cst_7 = arith.constant dense<0.000000e+00> : vector<128xf32>
    %8 = vector.multi_reduction <add>, %5, %cst_7 [0] : vector<8x128xf32> to vector<128xf32>
    %9 = vector.shape_cast %8 : vector<128xf32> to vector<1x128xf32>
    %10 = arith.mulf %5, %5 : vector<8x128xf32>
    %cst_8 = arith.constant dense<0.000000e+00> : vector<128xf32>
    %11 = vector.multi_reduction <add>, %10, %cst_8 [0] : vector<8x128xf32> to vector<128xf32>
    %12 = vector.shape_cast %11 : vector<128xf32> to vector<1x128xf32>
    %cst_9 = arith.constant 1.250000e-01 : f32
    %13 = vector.broadcast %cst_9 : f32 to vector<1x128xf32>
    %14 = arith.mulf %9, %13 : vector<1x128xf32>
    %cst_10 = arith.constant 1.250000e-01 : f32
    %15 = vector.broadcast %cst_10 : f32 to vector<1x128xf32>
    %16 = arith.mulf %12, %15 : vector<1x128xf32>
    %17 = arith.mulf %14, %14 : vector<1x128xf32>
    %18 = arith.subf %16, %17 : vector<1x128xf32>
    %cst_11 = arith.constant 9.99999974E-6 : f32
    %19 = vector.broadcast %cst_11 : f32 to vector<1x128xf32>
    %20 = arith.addf %18, %19 : vector<1x128xf32>
    %21 = math.rsqrt %20 : vector<1x128xf32>
    %22 = arith.mulf %6, %21 : vector<1x128xf32>
    %23 = arith.mulf %14, %22 : vector<1x128xf32>
    %24 = arith.subf %7, %23 : vector<1x128xf32>
    %25 = vector.broadcast %22 : vector<1x128xf32> to vector<8x128xf32>
    %26 = arith.mulf %5, %25 : vector<8x128xf32>
    %27 = vector.broadcast %24 : vector<1x128xf32> to vector<8x128xf32>
    %28 = arith.addf %26, %27 : vector<8x128xf32>
    %cst_12 = arith.constant 0.000000e+00 : f32
    %29 = vector.broadcast %cst_12 : f32 to vector<8x128xf32>
    %30 = arith.maximumf %28, %29 : vector<8x128xf32>
    %31 = arith.truncf %30 : vector<8x128xf32> to vector<8x128xbf16>
    %c0_13 = arith.constant 0 : index
    %c0_14 = arith.constant 0 : index
    %c0_15 = arith.constant 0 : index
    %32 = vector.load %arg2[%c0_13, %c0_14, %c0_15] : memref<1x128x128xbf16, #tpu.memory_space<vmem>>, vector<1x128x128xbf16>
    %33 = vector.shape_cast %32 : vector<1x128x128xbf16> to vector<128x128xbf16>
    %cst_16 = arith.constant dense<0.000000e+00> : vector<8x128xf32>
    %34 = tpu.matmul %31, %33, %cst_16 {dimension_numbers = #tpu.dot_dimension_numbers<[1], [0], [0], [1], [0, 0, 1, 1], [], []>} : vector<8x128xbf16>, vector<128x128xbf16>, vector<8x128xf32> -> vector<8x128xf32>
    %c3 = arith.constant 3 : index
    %c0_17 = arith.constant 0 : index
    %35 = vector.load %arg6[%c3, %c0_17] : memref<16x128xf32, #tpu.memory_space<vmem>>, vector<1x128xf32>
    %36 = vector.broadcast %35 : vector<1x128xf32> to vector<8x128xf32>
    %37 = arith.addf %34, %36 : vector<8x128xf32>
    %c4 = arith.constant 4 : index
    %c0_18 = arith.constant 0 : index
    %38 = vector.load %arg6[%c4, %c0_18] : memref<16x128xf32, #tpu.memory_space<vmem>>, vector<1x128xf32>
    %c5 = arith.constant 5 : index
    %c0_19 = arith.constant 0 : index
    %39 = vector.load %arg6[%c5, %c0_19] : memref<16x128xf32, #tpu.memory_space<vmem>>, vector<1x128xf32>
    %cst_20 = arith.constant dense<0.000000e+00> : vector<128xf32>
    %40 = vector.multi_reduction <add>, %37, %cst_20 [0] : vector<8x128xf32> to vector<128xf32>
    %41 = vector.shape_cast %40 : vector<128xf32> to vector<1x128xf32>
    %42 = arith.mulf %37, %37 : vector<8x128xf32>
    %cst_21 = arith.constant dense<0.000000e+00> : vector<128xf32>
    %43 = vector.multi_reduction <add>, %42, %cst_21 [0] : vector<8x128xf32> to vector<128xf32>
    %44 = vector.shape_cast %43 : vector<128xf32> to vector<1x128xf32>
    %cst_22 = arith.constant 1.250000e-01 : f32
    %45 = vector.broadcast %cst_22 : f32 to vector<1x128xf32>
    %46 = arith.mulf %41, %45 : vector<1x128xf32>
    %cst_23 = arith.constant 1.250000e-01 : f32
    %47 = vector.broadcast %cst_23 : f32 to vector<1x128xf32>
    %48 = arith.mulf %44, %47 : vector<1x128xf32>
    %49 = arith.mulf %46, %46 : vector<1x128xf32>
    %50 = arith.subf %48, %49 : vector<1x128xf32>
    %cst_24 = arith.constant 9.99999974E-6 : f32
    %51 = vector.broadcast %cst_24 : f32 to vector<1x128xf32>
    %52 = arith.addf %50, %51 : vector<1x128xf32>
    %53 = math.rsqrt %52 : vector<1x128xf32>
    %54 = arith.mulf %38, %53 : vector<1x128xf32>
    %55 = arith.mulf %46, %54 : vector<1x128xf32>
    %56 = arith.subf %39, %55 : vector<1x128xf32>
    %57 = vector.broadcast %54 : vector<1x128xf32> to vector<8x128xf32>
    %58 = arith.mulf %37, %57 : vector<8x128xf32>
    %59 = vector.broadcast %56 : vector<1x128xf32> to vector<8x128xf32>
    %60 = arith.addf %58, %59 : vector<8x128xf32>
    %cst_25 = arith.constant 0.000000e+00 : f32
    %61 = vector.broadcast %cst_25 : f32 to vector<8x128xf32>
    %62 = arith.maximumf %60, %61 : vector<8x128xf32>
    %63 = arith.truncf %62 : vector<8x128xf32> to vector<8x128xbf16>
    %c0_26 = arith.constant 0 : index
    %c0_27 = arith.constant 0 : index
    %64 = vector.load %arg4[%c0_26, %c0_27] : memref<128x128xbf16, #tpu.memory_space<vmem>>, vector<128x128xbf16>
    %cst_28 = arith.constant dense<0.000000e+00> : vector<8x128xf32>
    %65 = tpu.matmul %63, %64, %cst_28 {dimension_numbers = #tpu.dot_dimension_numbers<[1], [0], [0], [1], [0, 0, 1, 1], [], []>} : vector<8x128xbf16>, vector<128x128xbf16>, vector<8x128xf32> -> vector<8x128xf32>
    %c0_29 = arith.constant 0 : index
    %c0_30 = arith.constant 0 : index
    %66 = vector.load %arg5[%c0_29, %c0_30] : memref<1x128xf32, #tpu.memory_space<vmem>>, vector<1x128xf32>
    %67 = vector.broadcast %66 : vector<1x128xf32> to vector<8x128xf32>
    %68 = arith.addf %65, %67 : vector<8x128xf32>
    %c0_31 = arith.constant 0 : index
    %c0_32 = arith.constant 0 : index
    %69 = vector.load %arg3[%c0_31, %c0_32] : memref<128x128xbf16, #tpu.memory_space<vmem>>, vector<128x128xbf16>
    %cst_33 = arith.constant dense<0.000000e+00> : vector<8x128xf32>
    %70 = tpu.matmul %63, %69, %cst_33 {dimension_numbers = #tpu.dot_dimension_numbers<[1], [0], [0], [1], [0, 0, 1, 1], [], []>} : vector<8x128xbf16>, vector<128x128xbf16>, vector<8x128xf32> -> vector<8x128xf32>
    %c6 = arith.constant 6 : index
    %c0_34 = arith.constant 0 : index
    %71 = vector.load %arg6[%c6, %c0_34] : memref<16x128xf32, #tpu.memory_space<vmem>>, vector<1x128xf32>
    %72 = vector.broadcast %71 : vector<1x128xf32> to vector<8x128xf32>
    %73 = arith.addf %70, %72 : vector<8x128xf32>
    %c7 = arith.constant 7 : index
    %c0_35 = arith.constant 0 : index
    %74 = vector.load %arg6[%c7, %c0_35] : memref<16x128xf32, #tpu.memory_space<vmem>>, vector<1x128xf32>
    %c8 = arith.constant 8 : index
    %c0_36 = arith.constant 0 : index
    %75 = vector.load %arg6[%c8, %c0_36] : memref<16x128xf32, #tpu.memory_space<vmem>>, vector<1x128xf32>
    %cst_37 = arith.constant dense<0.000000e+00> : vector<128xf32>
    %76 = vector.multi_reduction <add>, %73, %cst_37 [0] : vector<8x128xf32> to vector<128xf32>
    %77 = vector.shape_cast %76 : vector<128xf32> to vector<1x128xf32>
    %78 = arith.mulf %73, %73 : vector<8x128xf32>
    %cst_38 = arith.constant dense<0.000000e+00> : vector<128xf32>
    %79 = vector.multi_reduction <add>, %78, %cst_38 [0] : vector<8x128xf32> to vector<128xf32>
    %80 = vector.shape_cast %79 : vector<128xf32> to vector<1x128xf32>
    %cst_39 = arith.constant 1.250000e-01 : f32
    %81 = vector.broadcast %cst_39 : f32 to vector<1x128xf32>
    %82 = arith.mulf %77, %81 : vector<1x128xf32>
    %cst_40 = arith.constant 1.250000e-01 : f32
    %83 = vector.broadcast %cst_40 : f32 to vector<1x128xf32>
    %84 = arith.mulf %80, %83 : vector<1x128xf32>
    %85 = arith.mulf %82, %82 : vector<1x128xf32>
    %86 = arith.subf %84, %85 : vector<1x128xf32>
    %cst_41 = arith.constant 9.99999974E-6 : f32
    %87 = vector.broadcast %cst_41 : f32 to vector<1x128xf32>
    %88 = arith.addf %86, %87 : vector<1x128xf32>
    %89 = math.rsqrt %88 : vector<1x128xf32>
    %90 = arith.mulf %74, %89 : vector<1x128xf32>
    %91 = arith.mulf %82, %90 : vector<1x128xf32>
    %92 = arith.subf %75, %91 : vector<1x128xf32>
    %93 = vector.broadcast %90 : vector<1x128xf32> to vector<8x128xf32>
    %94 = arith.mulf %73, %93 : vector<8x128xf32>
    %95 = vector.broadcast %92 : vector<1x128xf32> to vector<8x128xf32>
    %96 = arith.addf %94, %95 : vector<8x128xf32>
    %c9 = arith.constant 9 : index
    %c0_42 = arith.constant 0 : index
    %97 = vector.load %arg6[%c9, %c0_42] : memref<16x128xf32, #tpu.memory_space<vmem>>, vector<1x128xf32>
    %98 = vector.extract_strided_slice %68 {offsets = [0, 20], sizes = [8, 1], strides = [1, 1]} : vector<8x128xf32> to vector<8x1xf32>
    %99 = vector.broadcast %97 : vector<1x128xf32> to vector<8x128xf32>
    %100 = arith.mulf %96, %99 : vector<8x128xf32>
    %cst_43 = arith.constant dense<0.000000e+00> : vector<8xf32>
    %101 = vector.multi_reduction <add>, %100, %cst_43 [1] : vector<8x128xf32> to vector<8xf32>
    %102 = vector.shape_cast %101 : vector<8xf32> to vector<8x1xf32>
    %103 = arith.addf %102, %98 : vector<8x1xf32>
    %cst_44 = arith.constant 0.000000e+00 : f32
    %104 = vector.broadcast %cst_44 : f32 to vector<8x1xf32>
    %105 = arith.subf %104, %103 : vector<8x1xf32>
    %106 = math.exp %105 : vector<8x1xf32>
    %cst_45 = arith.constant 1.000000e+00 : f32
    %107 = vector.broadcast %cst_45 : f32 to vector<8x1xf32>
    %108 = arith.addf %107, %106 : vector<8x1xf32>
    %109 = tpu.reciprocal %108 {approx = true} : vector<8x1xf32> -> vector<8x1xf32>
    %110 = tpu.iota {dimensions = array<i32: 1>} : vector<8x128xi32>
    %c20_i32 = arith.constant 20 : i32
    %111 = vector.broadcast %c20_i32 : i32 to vector<8x128xi32>
    %112 = arith.cmpi eq, %110, %111 : vector<8x128xi32>
    %113 = vector.shape_cast %109 : vector<8x1xf32> to vector<8x1xf32>
    %114 = vector.broadcast %113 : vector<8x1xf32> to vector<8x128xf32>
    %115 = arith.select %112, %114, %68 : vector<8x128xi1>, vector<8x128xf32>
    %c0_46 = arith.constant 0 : index
    %c0_47 = arith.constant 0 : index
    %116 = vector.load %arg7[%c0_46, %c0_47] : memref<8x128xf32, #tpu.memory_space<vmem>>, vector<8x128xf32>
    tpu.vector_store %arg7[%c0_46, %c0_47], %115 {strides = array<i32>} : memref<8x128xf32, #tpu.memory_space<vmem>>, vector<8x128xf32>,
    return
  }
}

</mosaic_0001>

<bundles_post_ra>
// kernel: mlp_selectivenet_forward.1
= control target key start
LH: loop header
LB: loop body
LE: loop exit
PB: predicated region body
PF: predicated region fallthrough
CT: control target
= control target key end

     0   :  { %s838_s1 = inlined_call_operand.vmem [shape: bf16[128,128], index: 1, kind: input, shape index: {}]   ;;  %s839_s6 = inlined_call_operand.vmem [shape: f32[16,128], index: 6, kind: input, shape index: {}]   ;;  %s840_s0 = inlined_call_operand.vmem [shape: bf16[8,128], index: 0, kind: input, shape index: {}]   ;;  %s841_s2 = inlined_call_operand.vmem [shape: bf16[1,128,128], index: 2, kind: input, shape index: {}]   ;;  %s842_s5 = inlined_call_operand.vmem [shape: f32[1,128], index: 5, kind: input, shape index: {}]   ;;  %s843_s4 = inlined_call_operand.vmem [shape: bf16[128,128], index: 4, kind: input, shape index: {}]   ;;  %s844_s3 = inlined_call_operand.vmem [shape: bf16[128,128], index: 3, kind: input, shape index: {}]   ;;  %s845_s7 = inlined_call_operand.vmem [shape: f32[8,128], index: 7, kind: output, shape index: {}]  }
   0x1   :  { %v620_v0 = vld [vmem:[%s838_s1 + $0x38] sm:$0xff]  ;;  %v619_v1 = vld [vmem:[%s838_s1 + $0x30] sm:$0xff]  ;;  %v618_v2 = vld [vmem:[%s838_s1 + $0x28] sm:$0xff] }
   0x2   :  { %93 = vmatpush.bf16.msra.mxu0 %v620_v0  ;;  %v617_v3 = vld [vmem:[%s838_s1 + $0x20] sm:$0xff]  ;;  %v616_v4 = vld [vmem:[%s838_s1 + $0x18] sm:$0xff]  ;;  %v615_v5 = vld [vmem:[%s838_s1 + $0x10] sm:$0xff] }
   0x3   :  { %v614_v6 = vld [vmem:[%s838_s1 + $0x8] sm:$0xff]  ;;  %v613_v7 = vld [vmem:[%s838_s1] sm:$0xff]  ;;  %v628_v9 = vld [vmem:[%s841_s2 + $0x38] sm:$0xff] }
   0x4   :  { %v26_v8 = vld [vmem:[%s840_s0] sm:$0xf]  ;;  %211 = vmatpush.bf16.msra.mxu1 %v628_v9  ;;  %v627_v10 = vld [vmem:[%s841_s2 + $0x30] sm:$0xff]  ;;  %v626_v11 = vld [vmem:[%s841_s2 + $0x28] sm:$0xff] }
   0x5   :  { %v625_v12 = vld [vmem:[%s841_s2 + $0x20] sm:$0xff]  ;;  %v624_v14 = vld [vmem:[%s841_s2 + $0x18] sm:$0xff]  ;;  %v623_v17 = vld [vmem:[%s841_s2 + $0x10] sm:$0xff] }
   0x6   :  { %94 = vmatpush.bf16.msra.mxu0 %v619_v1  ;;  %v647_v13 = vld [vmem:[%s839_s6] ss:$0 sm:$0xff]  ;;  %v622_v22 = vld [vmem:[%s841_s2 + $0x8] sm:$0xff]  ;;  %v106_v44 = vld [vmem:[%s839_s6 + $0x1] sm:$0x1] }
   0x7   :  { %v621_v28 = vld [vmem:[%s841_s2] sm:$0xff]  ;;  %v636_v57 = vld [vmem:[%s843_s4 + $0x38] sm:$0xff]  ;;  %v635_v59 = vld [vmem:[%s843_s4 + $0x30] sm:$0xff] }
   0x8   :  { %212 = vmatpush.bf16.msra.mxu1 %v627_v10  ;;  %v107_v48 = vld [vmem:[%s839_s6 + $0x2] sm:$0x1]  ;;  %v644_v58 = vld [vmem:[%s844_s3 + $0x38] sm:$0xff]  ;;  %331 = vmatpush.bf16.msra.mxu2 %v636_v57  ;;  %v643_v60 = vld [vmem:[%s844_s3 + $0x30] sm:$0xff] }
   0x9   :  { %410 = vmatpush.bf16.msra.mxu3 %v644_v58  ;;  %v634_v61 = vld [vmem:[%s843_s4 + $0x28] sm:$0xff]  ;;  %v633_v63 = vld [vmem:[%s843_s4 + $0x20] sm:$0xff] }
   0xa   :  { %95 = vmatpush.bf16.msra.mxu0 %v618_v2  ;;  %v642_v62 = vld [vmem:[%s844_s3 + $0x28] sm:$0xff]  ;;  %v641_v0 = vld [vmem:[%s844_s3 + $0x20] sm:$0xff]  ;;  %v632_v2 = vld [vmem:[%s843_s4 + $0x18] sm:$0xff] }
   0xb   :  { %v648_v1 = vld [vmem:[%s839_s6 + $0x3] ss:$0 sm:$0xff] }
   0xc   :  { %213 = vmatpush.bf16.msra.mxu1 %v626_v11  ;;  %332 = vmatpush.bf16.msra.mxu2 %v635_v59 }
   0xd   :  { %411 = vmatpush.bf16.msra.mxu3 %v643_v60 }
   0xe   :  { %96 = vmatpush.bf16.msra.mxu0 %v617_v3  ;;  %v640_v3 = vld [vmem:[%s844_s3 + $0x18] sm:$0xff] }
  0x10   :  { %214 = vmatpush.bf16.msra.mxu1 %v625_v12  ;;  %333 = vmatpush.bf16.msra.mxu2 %v634_v61  ;;  %v630_v12 = vld [vmem:[%s843_s4 + $0x8] sm:$0xff] }
  0x11   :  { %412 = vmatpush.bf16.msra.mxu3 %v642_v62 }
  0x12   :  { %97 = vmatpush.bf16.msra.mxu0 %v616_v4 }
  0x14   :  { %215 = vmatpush.bf16.msra.mxu1 %v624_v14  ;;  %334 = vmatpush.bf16.msra.mxu2 %v633_v63 }
  0x15   :  { %413 = vmatpush.bf16.msra.mxu3 %v641_v0 }
  0x16   :  { %98 = vmatpush.bf16.msra.mxu0 %v615_v5 }
  0x18   :  { %216 = vmatpush.bf16.msra.mxu1 %v623_v17  ;;  %335 = vmatpush.bf16.msra.mxu2 %v632_v2 }
  0x19   :  { %414 = vmatpush.bf16.msra.mxu3 %v640_v3 }
  0x1a   :  { %99 = vmatpush.bf16.msra.mxu0 %v614_v6  ;;  %v631_v6 = vld [vmem:[%s843_s4 + $0x10] sm:$0xff] }
  0x1c   :  { %217 = vmatpush.bf16.msra.mxu1 %v622_v22  ;;  %336 = vmatpush.bf16.msra.mxu2 %v631_v6 }
  0x1e   :  { %100 = vmatpush.bf16.msra.mxu0 %v613_v7  ;;  %v639_v7 = vld [vmem:[%s844_s3 + $0x10] sm:$0xff] }
  0x1f   :  { %415 = vmatpush.bf16.msra.mxu3 %v639_v7 }
  0x20   :  { %218 = vmatpush.bf16.msra.mxu1 %v621_v28  ;;  %337 = vmatpush.bf16.msra.mxu2 %v630_v12 }
  0x21   :  { %101 = vmatmul.bf16.vlgmr.msra.gmra.mxu0 %v26_v8 }
  0x9e   :  { %v102_v15 = vpop.f32.mrf.mxu0 }
  0x9f   :  { %v103_v16 = vadd.f32 %v647_v13, %v102_v15  ;;  %v638_v13 = vld [vmem:[%s844_s3 + $0x8] sm:$0xff] }
  0xa0   :  { %416 = vmatpush.bf16.msra.mxu3 %v638_v13 }
  0xa1   :  { %v108_v18 = vrot.slane %v103_v16, 4  ;;  %v114_v19 = vmul.f32 %v103_v16, %v103_v16 }
  0xa3   :  { %v109_v20 = vadd.f32 %v108_v18, %v103_v16  ;;  %v115_v21 = vrot.slane %v114_v19, 4 }
  0xa5   :  { %v110_v23 = vrot.slane %v109_v20, 2  ;;  %v116_v24 = vadd.f32 %v115_v21, %v114_v19  ;;  %v629_v19 = vld [vmem:[%s843_s4] sm:$0xff] }
  0xa6   :  { %v104_v25 = vpop.f32.mrf.mxu0  ;;  %338 = vmatpush.bf16.msra.mxu2 %v629_v19 }
  0xa7   :  { %v111_v26 = vadd.f32 %v110_v23, %v109_v20  ;;  %v117_v27 = vrot.slane %v116_v24, 2  ;;  %v637_v20 = vld [vmem:[%s844_s3] sm:$0xff] }
  0xa8   :  { %417 = vmatpush.bf16.msra.mxu3 %v637_v20 }
  0xa9   :  { %v118_v29 = vadd.f32 %v117_v27, %v116_v24  ;;  %v112_v30 = vrot.slane %v111_v26, 1 }
  0xab   :  { %v119_v31 = vrot.slane %v118_v29, 1  ;;  %v113_v32 = vadd.f32 %v112_v30, %v111_v26 }
  0xad   :  { %v120_v33 = vadd.f32 %v119_v31, %v118_v29  ;;  %v121_v34 = vmul.f32 0.125, %v113_v32 }
  0xaf   :  { %v122_v35 = vmul.f32 0.125, %v120_v33  ;;  %v123_v36 = vmul.f32 %v121_v34, %v121_v34 }
  0xb1   :  { %v124_v37 = vsub.f32 %v122_v35, %v123_v36  ;;  %v224_v36 = vld [vmem:[%s839_s6 + $0x4] sm:$0x1] }
  0xb3   :  { %v125_v38 = vadd.f32 1e-05, %v124_v37 }
  0xb5   :  { %652 = vrsqrt.f32 %v125_v38  ;;  %vm132_vm1 = vweird.f32 %v125_v38 }
  0xbb   :  { %v653_v39 = vpop.eup %652 }
  0xbc   :  { %v127_v40 = vmul.f32 %v653_v39, %v125_v38  ;;  %vm133_vm0 = vweird.f32 %v653_v39 }
  0xbd   :  { %vm134_vm2 = vmor %vm132_vm1, %vm133_vm0 }
  0xbe   :  { %v128_v41 = vmul.f32 %v653_v39, %v127_v40  ;;  %v225_v40 = vld [vmem:[%s839_s6 + $0x5] sm:$0x1] }
  0xc0   :  { %v129_v42 = vmul.f32 0.5, %v128_v41 }
  0xc2   :  { %v130_v43 = vsub.f32 1.5, %v129_v42 }
  0xc4   :  { %v131_v45 = vmul.f32 %v653_v39, %v130_v43 }
  0xc6   :  { %v135_v46 = vsel %vm134_vm2, %v653_v39, %v131_v45 }
  0xc7   :  { %v136_v47 = vmul.f32 %v135_v46, %v106_v44 }
  0xc9   :  { %v137_v49 = vmul.f32 %v136_v47, %v121_v34  ;;  %v139_v50 = vperm.slane %v136_v47, 0 }
  0xcb   :  { %v138_v51 = vsub.f32 %v107_v48, %v137_v49  ;;  %v140_v52 = vmul.f32 %v139_v50, %v103_v16  ;;  %v650_v49 = vld [vmem:[%s839_s6 + $0x6] ss:$0 sm:$0xff] }
  0xcd   :  { %v141_v53 = vperm.slane %v138_v51, 0 }
  0xcf   :  { %v142_v54 = vadd.f32 %v141_v53, %v140_v52 }
  0xd1   :  { %v143_v55 = vmax.f32 %v142_v54, 0.0 }
  0xd3   :  { %v144_v56 = vpack.c.bf16 %v143_v55, %v143_v55 }
  0xd5   :  { %219 = vmatmul.bf16.vlgmr.msra.gmra.mxu1 %v144_v56 }
 0x152   :  { %v220_v4 = vpop.f32.mrf.mxu1 }
 0x153   :  { %v221_v5 = vadd.f32 %v648_v1, %v220_v4 }
 0x155   :  { %v226_v8 = vrot.slane %v221_v5, 4  ;;  %v232_v9 = vmul.f32 %v221_v5, %v221_v5 }
 0x157   :  { %v227_v10 = vadd.f32 %v226_v8, %v221_v5  ;;  %v233_v11 = vrot.slane %v232_v9, 4 }
 0x159   :  { %v228_v14 = vrot.slane %v227_v10, 2  ;;  %v234_v15 = vadd.f32 %v233_v11, %v232_v9 }
 0x15a   :  { %v222_v16 = vpop.f32.mrf.mxu1 }
 0x15b   :  { %v229_v17 = vadd.f32 %v228_v14, %v227_v10  ;;  %v235_v18 = vrot.slane %v234_v15, 2  ;;  %v423_v14 = vld [vmem:[%s839_s6 + $0x7] sm:$0x1] }
 0x15d   :  { %v236_v21 = vadd.f32 %v235_v18, %v234_v15  ;;  %v230_v22 = vrot.slane %v229_v17, 1  ;;  %v424_v18 = vld [vmem:[%s839_s6 + $0x8] sm:$0x1] }
 0x15f   :  { %v237_v23 = vrot.slane %v236_v21, 1  ;;  %v231_v24 = vadd.f32 %v230_v22, %v229_v17 }
 0x161   :  { %v238_v25 = vadd.f32 %v237_v23, %v236_v21  ;;  %v239_v26 = vmul.f32 0.125, %v231_v24  ;;  %v651_v24 = vld [vmem:[%s839_s6 + $0x9] ss:$0 sm:$0xff] }
 0x163   :  { %v240_v27 = vmul.f32 0.125, %v238_v25  ;;  %v241_v28 = vmul.f32 %v239_v26, %v239_v26 }
 0x165   :  { %v242_v29 = vsub.f32 %v240_v27, %v241_v28  ;;  %v662_v27 = vmov 20   ;;  %v649_v28 = vld [vmem:[%s842_s5] ss:$0 sm:$0xff] }
 0x166   :  { %646 = vset.pattern.permute.xlu0 %v662_v27 }
 0x167   :  { %v243_v30 = vadd.f32 1e-05, %v242_v29 }
 0x169   :  { %654 = vrsqrt.f32 %v243_v30  ;;  %vm250_vm4 = vweird.f32 %v243_v30 }
 0x16f   :  { %v655_v31 = vpop.eup %654 }
 0x170   :  { %v245_v32 = vmul.f32 %v655_v31, %v243_v30  ;;  %vm251_vm3 = vweird.f32 %v655_v31 }
 0x171   :  { %vm252_vm5 = vmor %vm250_vm4, %vm251_vm3 }
 0x172   :  { %v246_v33 = vmul.f32 %v655_v31, %v245_v32 }
 0x174   :  { %v247_v34 = vmul.f32 0.5, %v246_v33 }
 0x176   :  { %v248_v35 = vsub.f32 1.5, %v247_v34 }
 0x178   :  { %v249_v37 = vmul.f32 %v655_v31, %v248_v35 }
 0x17a   :  { %v253_v38 = vsel %vm252_vm5, %v655_v31, %v249_v37  ;;  %v471_v37 = vlaneseq }
 0x17b   :  { %v254_v39 = vmul.f32 %v253_v38, %v224_v36 }
 0x17c   :  { %v472_v38 = vand.u32 127, %v471_v37 }
 0x17d   :  { %v255_v41 = vmul.f32 %v254_v39, %v239_v26  ;;  %v257_v42 = vperm.slane %v254_v39, 0 }
 0x17e   :  { %vm473_vm9 = vcmp.eq.s32.totalorder %v472_v38, 20 }
 0x17f   :  { %v256_v43 = vsub.f32 %v225_v40, %v255_v41  ;;  %v258_v44 = vmul.f32 %v257_v42, %v221_v5 }
 0x181   :  { %v259_v45 = vperm.slane %v256_v43, 0 }
 0x183   :  { %v260_v46 = vadd.f32 %v259_v45, %v258_v44 }
 0x185   :  { %v261_v47 = vmax.f32 %v260_v46, 0.0 }
 0x187   :  { %v262_v48 = vpack.c.bf16 %v261_v47, %v261_v47 }
 0x189   :  { %339 = vmatmul.bf16.vlgmr.msra.gmra.mxu2 %v262_v48  ;;  %418 = vmatmul.bf16.vlgmr.msra.gmra.mxu3 %v262_v48 }
 0x20c   :  { %v340_v50 = vpop.f32.mrf.mxu2  ;;  %v419_v51 = vpop.f32.mrf.mxu3 }
 0x20d   :  { %v420_v52 = vadd.f32 %v650_v49, %v419_v51  ;;  %v341_v29 = vadd.f32 %v649_v28, %v340_v50 }
 0x20f   :  { %v425_v53 = vrot.slane %v420_v52, 4  ;;  %v431_v54 = vmul.f32 %v420_v52, %v420_v52 }
 0x211   :  { %v426_v55 = vadd.f32 %v425_v53, %v420_v52  ;;  %v432_v56 = vrot.slane %v431_v54, 4 }
 0x213   :  { %v427_v57 = vrot.slane %v426_v55, 2  ;;  %v433_v58 = vadd.f32 %v432_v56, %v431_v54 }
 0x214   :  { %v342_v59 = vpop.f32.mrf.mxu2  ;;  %v421_v60 = vpop.f32.mrf.mxu3 }
 0x215   :  { %v428_v61 = vadd.f32 %v427_v57, %v426_v55  ;;  %v434_v62 = vrot.slane %v433_v58, 2 }
 0x217   :  { %v435_v63 = vadd.f32 %v434_v62, %v433_v58  ;;  %v429_v0 = vrot.slane %v428_v61, 1 }
 0x219   :  { %v436_v1 = vrot.slane %v435_v63, 1  ;;  %v430_v2 = vadd.f32 %v429_v0, %v428_v61 }
 0x21b   :  { %v437_v3 = vadd.f32 %v436_v1, %v435_v63  ;;  %v438_v4 = vmul.f32 0.125, %v430_v2 }
 0x21d   :  { %v439_v5 = vmul.f32 0.125, %v437_v3  ;;  %v440_v6 = vmul.f32 %v438_v4, %v438_v4 }
 0x21f   :  { %v441_v7 = vsub.f32 %v439_v5, %v440_v6 }
 0x221   :  { %v442_v8 = vadd.f32 1e-05, %v441_v7 }
 0x223   :  { %656 = vrsqrt.f32 %v442_v8  ;;  %vm449_vm7 = vweird.f32 %v442_v8 }
 0x229   :  { %v657_v9 = vpop.eup %656 }
 0x22a   :  { %v444_v10 = vmul.f32 %v657_v9, %v442_v8  ;;  %vm450_vm6 = vweird.f32 %v657_v9 }
 0x22b   :  { %vm451_vm8 = vmor %vm449_vm7, %vm450_vm6 }
 0x22c   :  { %v445_v11 = vmul.f32 %v657_v9, %v444_v10 }
 0x22e   :  { %v446_v12 = vmul.f32 0.5, %v445_v11 }
 0x230   :  { %v447_v13 = vsub.f32 1.5, %v446_v12 }
 0x232   :  { %v448_v15 = vmul.f32 %v657_v9, %v447_v13 }
 0x234   :  { %v452_v16 = vsel %vm451_vm8, %v657_v9, %v448_v15 }
 0x235   :  { %v453_v17 = vmul.f32 %v452_v16, %v423_v14 }
 0x237   :  { %v454_v19 = vmul.f32 %v453_v17, %v438_v4  ;;  %v456_v20 = vperm.slane %v453_v17, 0 }
 0x239   :  { %v455_v21 = vsub.f32 %v424_v18, %v454_v19  ;;  %v457_v22 = vmul.f32 %v456_v20, %v420_v52 }
 0x23b   :  { %v458_v23 = vperm.slane %v455_v21, 0 }
 0x23d   :  { %v459_v25 = vadd.f32 %v458_v23, %v457_v22 }
 0x23f   :  { %v462_v26 = vmul.f32 %v651_v24, %v459_v25 }
 0x241   :  { %463 = vadd.xlane.f32.xlu0 %v462_v26 }
 0x2b4   :  { %v464_v30 = vpop.xlane.xlu0 %463 }
 0x2b5   :  { %v465_v31 = vadd.f32 %v464_v30, %v341_v29 }
 0x2b7   :  { %v466_v32 = vsub.f32 0.0, %v465_v31 }
 0x2b9   :  { %v467_v33 = vmul.f32 1.442695, %v466_v32 }
 0x2bb   :  { %658 = vpow2.f32 %v467_v33 }
 0x2c1   :  { %v659_v34 = vpop.eup %658 }
 0x2c2   :  { %v469_v35 = vadd.f32 1.0, %v659_v34 }
 0x2c4   :  { %660 = vrcp.f32 %v469_v35 }
 0x2ca   :  { %v661_v36 = vpop.eup %660 }
 0x2cb   :  { %476 = vperm.xlu0 %646, %v661_v36  }
 0x33d   :  { %v477_v39 = vpop.permute.xlu0 %476 }
 0x33e   :  { %v479_v40 = vsel %vm473_vm9, %v477_v39, %v341_v29 }
 0x33f   :  { %480 = vst [vmem:[%s845_s7] sm:$0xff] %v479_v40 }

</bundles_post_ra>
